<compile_context>
chip_gen: v6e
topology: v6e:2x2x1
jax: 0.10.0
libtpu: 0.0.40
codegen_flags: <defaults>
</compile_context>

<pallas_src>
import jax
import jax.numpy as jnp
from jax import lax
from jax.experimental import pallas as pl
from jax.experimental.pallas import tpu as pltpu

LANES = 128
SUBLANES = 8


def _round_up(x, m):
    return (x + m - 1) // m * m


def _sublane_multiple(dtype):
    size = jnp.dtype(dtype).itemsize
    if size >= 4:
        return 8
    if size == 2:
        return 16
    return 32


def _target_block_rows(dtype):
    # ~1 MiB per input block regardless of element width.
    size = jnp.dtype(dtype).itemsize
    return {4: 2048, 2: 4096, 1: 8192}.get(size, 2048)


# ---------------- reduce kernels ('mean' / 'sum') ----------------

def _make_reduce_kernel(rows, row_tiles, block_rows, steps, has_weight,
                        need_wsum):
    """Kernel over grid (n_parts, steps); one (block_rows,128) tile per step."""
    groups = block_rows // SUBLANES

    def fold(x):
        # (block_rows,128) -> (8,128) with plain vreg adds (tile-aligned reshape).
        return jnp.sum(x.reshape(groups, SUBLANES, LANES), axis=0)

    def body(p_ref, t_ref, w_ref, out_ref, wsum_ref, acc_ref, wacc_ref):
        p = pl.program_id(0)
        i = pl.program_id(1)
        linear = p * steps + i  # global tile index (clamped in index_map)

        @pl.when(i == 0)
        def _():
            acc_ref[...] = jnp.zeros_like(acc_ref)
            if wacc_ref is not None:
                wacc_ref[...] = jnp.zeros_like(wacc_ref)

        def step(masked):
            d = p_ref[...].astype(jnp.float32) - t_ref[...].astype(jnp.float32)
            dd = d * d
            w = None
            if w_ref is not None:
                w = w_ref[...].astype(jnp.float32)
                dd = dd * w
            if masked:
                # Tail / duplicate block: zero out rows beyond the real data.
                valid = rows - linear * block_rows
                row_id = lax.broadcasted_iota(jnp.int32, (block_rows, LANES), 0)
                keep = row_id < valid
                dd = jnp.where(keep, dd, 0.0)
                if wacc_ref is not None:
                    w = jnp.where(keep, w, 0.0)
            acc_ref[...] += fold(dd)
            if wacc_ref is not None:
                wacc_ref[...] += fold(w)

        # Interior blocks: no mask overhead.
        @pl.when(linear < row_tiles - 1)
        def _():
            step(masked=False)

        # Last real block (possibly partial) and any duplicate overshoot steps.
        @pl.when(linear >= row_tiles - 1)
        def _():
            step(masked=True)

        @pl.when(i == steps - 1)
        def _():
            # TODO(synk): an SMEM (1,1) scalar output per part would also drop
            # the tiny trailing XLA reduce; kept (8,128) partials for safety.
            out_ref[...] = acc_ref[...]
            if wsum_ref is not None:
                wsum_ref[...] = wacc_ref[...]

    if has_weight and need_wsum:
        def kernel(p_ref, t_ref, w_ref, out_ref, wsum_ref, acc_ref, wacc_ref):
            body(p_ref, t_ref, w_ref, out_ref, wsum_ref, acc_ref, wacc_ref)
    elif has_weight:
        def kernel(p_ref, t_ref, w_ref, out_ref, acc_ref):
            body(p_ref, t_ref, w_ref, out_ref, None, acc_ref, None)
    else:
        def kernel(p_ref, t_ref, out_ref, acc_ref):
            body(p_ref, t_ref, None, out_ref, None, acc_ref, None)
    return kernel


# ---------------- elementwise kernels ('none') ----------------

def _make_elem_kernel(loss_weight, has_weight):
    lw = float(loss_weight)  # folded in-kernel: no extra HBM pass

    if has_weight:
        def kernel(p_ref, t_ref, w_ref, o_ref):
            d = p_ref[...].astype(jnp.float32) - t_ref[...].astype(jnp.float32)
            o_ref[...] = (d * d * w_ref[...].astype(jnp.float32) * lw).astype(
                o_ref.dtype)
    else:
        def kernel(p_ref, t_ref, o_ref):
            d = p_ref[...].astype(jnp.float32) - t_ref[...].astype(jnp.float32)
            o_ref[...] = (d * d * lw).astype(o_ref.dtype)
    return kernel


class MSELoss:
    """MSE (L2) loss with Pallas TPU kernels for the hot path."""

    def __init__(self, loss_weight=1.0, reduction='mean'):
        if reduction not in ('none', 'mean', 'sum'):
            raise ValueError(
                f'Unsupported reduction mode: {reduction}. '
                f"Supported ones are: ['none', 'mean', 'sum']")
        self.loss_weight = loss_weight
        self.reduction = reduction

    def __call__(self, pred, target, weight=None):
        has_weight = weight is not None
        if has_weight and weight.shape != pred.shape:
            # TODO(synk): stride-0 / index_map reuse for broadcastable (C==1)
            # weights would avoid materializing this full-size HBM copy.
            weight = jnp.broadcast_to(weight, pred.shape)

        n = int(pred.size)
        n128 = _round_up(n, LANES)
        rows = n128 // LANES

        def to_rows(x):
            flat = x.reshape(-1)
            if n128 != n:
                # Only hit when n % 128 != 0 (rare for NCHW image tensors).
                flat = jnp.pad(flat, (0, n128 - n))
            return flat.reshape(rows, LANES)  # reshape is free when no pad

        dtypes = [pred.dtype, target.dtype] + ([weight.dtype] if has_weight else [])
        mult = max(_sublane_multiple(dt) for dt in dtypes)
        block_rows = min(_round_up(_target_block_rows(pred.dtype), mult),
                         _round_up(rows, mult))
        row_tiles = pl.cdiv(rows, block_rows)

        # ---------------- reduction='none' ----------------
        if self.reduction == 'none':
            inputs = [to_rows(pred), to_rows(target)]
            if has_weight:
                inputs.append(to_rows(weight))
            tile_spec = pl.BlockSpec((block_rows, LANES), lambda i: (i, 0))

            out2 = pl.pallas_call(
                _make_elem_kernel(self.loss_weight, has_weight),
                out_shape=jax.ShapeDtypeStruct((rows, LANES), pred.dtype),
                grid=(row_tiles,),
                in_specs=[tile_spec] * len(inputs),
                out_specs=tile_spec,
                compiler_params=pltpu.CompilerParams(
                    dimension_semantics=("parallel",)),
            )(*inputs)

            if n128 == n:
                return out2.reshape(pred.shape)
            return out2.reshape(-1)[:n].reshape(pred.shape)

        # ---------------- reduction='mean' / 'sum' ----------------
        # 2-way split so both v7x TensorCores get half the stream (serial and
        # harmless on 1-TC chips).  The last part may have one duplicate step
        # (clamped index_map); the kernel masks its contribution to zero.
        n_parts = 2 if row_tiles >= 2 else 1
        steps = pl.cdiv(row_tiles, n_parts)
        need_wsum = has_weight and self.reduction == 'mean'

        inputs = [to_rows(pred), to_rows(target)]
        if has_weight:
            inputs.append(to_rows(weight))

        last_tile = row_tiles - 1
        tile_spec = pl.BlockSpec(
            (block_rows, LANES),
            lambda p, i: (jnp.minimum(p * steps + i, last_tile), 0))
        part_spec = pl.BlockSpec((SUBLANES, LANES), lambda p, i: (p, 0))
        part_shape = jax.ShapeDtypeStruct((n_parts * SUBLANES, LANES),
                                          jnp.float32)

        kernel = _make_reduce_kernel(rows, row_tiles, block_rows, steps,
                                     has_weight, need_wsum)

        scratch = [pltpu.VMEM((SUBLANES, LANES), jnp.float32)]
        if need_wsum:
            scratch.append(pltpu.VMEM((SUBLANES, LANES), jnp.float32))
            out_shape = (part_shape, part_shape)
            out_specs = [part_spec, part_spec]
        else:
            out_shape = part_shape
            out_specs = part_spec

        result = pl.pallas_call(
            kernel,
            out_shape=out_shape,
            grid_spec=pltpu.PrefetchScalarGridSpec(
                num_scalar_prefetch=0,
                grid=(n_parts, steps),
                in_specs=[tile_spec] * len(inputs),
                out_specs=out_specs,
                scratch_shapes=scratch),
            # TODO(synk): verify "parallel" actually shards the parts axis across
            # both v7x TensorCores; switch to pltpu.CORE_PARALLEL if not.
            compiler_params=pltpu.CompilerParams(
                dimension_semantics=("parallel", "arbitrary")),
        )(*inputs)

        if need_wsum:
            loss_parts, w_parts = result
            loss = jnp.sum(loss_parts) / jnp.sum(w_parts)
        else:
            loss = jnp.sum(result)
            if self.reduction == 'mean':
                # note: f32 divisor rounding for n > 2^24 is ~1e-7 relative.
                loss = loss / n

        return (self.loss_weight * loss).astype(pred.dtype)


if __name__ == "__main__":
    key = jax.random.PRNGKey(0)
    k1, k2, k3, k4, k5 = jax.random.split(key, 5)
    shape = (2, 4, 16, 16)  # (N, C, H, W)
    pred = jax.random.normal(k1, shape, dtype=jnp.float32)
    target = jax.random.normal(k2, shape, dtype=jnp.float32)
    weight = jax.random.uniform(k3, shape, dtype=jnp.float32)

    # default: reduction='mean', no weight
    out = jax.block_until_ready(MSELoss(1.0, 'mean')(pred, target))
    ref = jnp.mean((pred - target) ** 2)
    assert jnp.allclose(out, ref, rtol=1e-5, atol=1e-6), "mean mismatch"

    # reduction='sum'
    out_s = jax.block_until_ready(MSELoss(2.0, 'sum')(pred, target))
    ref_s = 2.0 * jnp.sum((pred - target) ** 2)
    assert jnp.allclose(out_s, ref_s, rtol=1e-5, atol=1e-4), "sum mismatch"

    # reduction='none' (loss_weight folded into the kernel)
    out_n = jax.block_until_ready(MSELoss(3.0, 'none')(pred, target))
    ref_n = 3.0 * (pred - target) ** 2
    assert jnp.allclose(out_n, ref_n, rtol=1e-5, atol=1e-6), "none mismatch"

    # weighted mean
    out_w = jax.block_until_ready(MSELoss(1.0, 'mean')(pred, target, weight))
    ref_w = jnp.sum((pred - target) ** 2 * weight) / jnp.sum(weight)
    assert jnp.allclose(out_w, ref_w, rtol=1e-5, atol=1e-6), "wmean mismatch"

    # weighted sum (no weight-sum computed in this path)
    out_ws = jax.block_until_ready(MSELoss(1.0, 'sum')(pred, target, weight))
    ref_ws = jnp.sum((pred - target) ** 2 * weight)
    assert jnp.allclose(out_ws, ref_ws, rtol=1e-5, atol=1e-4), "wsum mismatch"

    # odd-sized tensor (n % 128 != 0) exercises lane-pad + in-kernel tail mask
    shape2 = (2, 3, 5, 7)
    p2 = jax.random.normal(k4, shape2, dtype=jnp.float32)
    t2 = jax.random.normal(k5, shape2, dtype=jnp.float32)
    out2 = jax.block_until_ready(MSELoss(1.0, 'mean')(p2, t2))
    ref2 = jnp.mean((p2 - t2) ** 2)
    assert jnp.allclose(out2, ref2, rtol=1e-5, atol=1e-6), "odd mean mismatch"
    out2n = jax.block_until_ready(MSELoss(1.0, 'none')(p2, t2))
    ref2n = (p2 - t2) ** 2
    assert jnp.allclose(out2n, ref2n, rtol=1e-5, atol=1e-6), "odd none mismatch"

    print("KERNEL_OK")
</pallas_src>

<mosaic_0001>
module attributes {stable_mosaic.version = 11 : i64} {
  func.func @kernel(%arg0: i32, %arg1: i32, %arg2: memref<16x128xf32, #tpu.memory_space<vmem>>, %arg3: memref<16x128xf32, #tpu.memory_space<vmem>>, %arg4: memref<8x128xf32, #tpu.memory_space<vmem>>, %arg5: memref<8x128xf32, #tpu.memory_space<vmem>>) attributes {dimension_semantics = [#tpu.dimension_semantics<parallel>, #tpu.dimension_semantics<arbitrary>], iteration_bounds = array<i64: 1, 1>, scalar_prefetch = 0 : i64, scratch_operands = 1 : i64, tpu.core_type = #tpu.core_type<tc>, window_params = [{transform_indices = @transform_0, window_bounds = array<i64: 16, 128>}, {transform_indices = @transform_1, window_bounds = array<i64: 16, 128>}, {transform_indices = @transform_2, window_bounds = array<i64: 8, 128>}]} {
    %c1_i32 = arith.constant 1 : i32
    %0 = arith.muli %arg0, %c1_i32 : i32
    %1 = arith.addi %0, %arg1 : i32
    %c0_i32 = arith.constant 0 : i32
    %2 = arith.cmpi eq, %arg1, %c0_i32 : i32
    %3 = arith.extui %2 : i1 to i32
    %c0_i32_0 = arith.constant 0 : i32
    %4 = arith.cmpi ne, %3, %c0_i32_0 : i32
    scf.if %4 {
      %cst = arith.constant 0.000000e+00 : f32
      %14 = vector.broadcast %cst : f32 to vector<8x128xf32>
      %c0 = arith.constant 0 : index
      %c0_7 = arith.constant 0 : index
      %15 = vector.load %arg5[%c0, %c0_7] : memref<8x128xf32, #tpu.memory_space<vmem>>, vector<8x128xf32>
      tpu.vector_store %arg5[%c0, %c0_7], %14 {strides = array<i32>} : memref<8x128xf32, #tpu.memory_space<vmem>>, vector<8x128xf32>,
    } else {
    }
    %c0_i32_1 = arith.constant 0 : i32
    %5 = arith.cmpi slt, %1, %c0_i32_1 : i32
    %6 = arith.extui %5 : i1 to i32
    %c0_i32_2 = arith.constant 0 : i32
    %7 = arith.cmpi ne, %6, %c0_i32_2 : i32
    scf.if %7 {
      %c0 = arith.constant 0 : index
      %c0_7 = arith.constant 0 : index
      %14 = vector.load %arg2[%c0, %c0_7] : memref<16x128xf32, #tpu.memory_space<vmem>>, vector<16x128xf32>
      %c0_8 = arith.constant 0 : index
      %c0_9 = arith.constant 0 : index
      %15 = vector.load %arg3[%c0_8, %c0_9] : memref<16x128xf32, #tpu.memory_space<vmem>>, vector<16x128xf32>
      %16 = arith.subf %14, %15 : vector<16x128xf32>
      %17 = arith.mulf %16, %16 : vector<16x128xf32>
      %c0_10 = arith.constant 0 : index
      %c0_11 = arith.constant 0 : index
      %18 = vector.load %arg5[%c0_10, %c0_11] : memref<8x128xf32, #tpu.memory_space<vmem>>, vector<8x128xf32>
      %19 = vector.shape_cast %17 : vector<16x128xf32> to vector<2x8x128xf32>
      %cst = arith.constant dense<0.000000e+00> : vector<8x128xf32>
      %20 = vector.multi_reduction <add>, %19, %cst [0] : vector<2x8x128xf32> to vector<8x128xf32>
      %21 = arith.addf %18, %20 : vector<8x128xf32>
      %c0_12 = arith.constant 0 : index
      %c0_13 = arith.constant 0 : index
      %22 = vector.load %arg5[%c0_12, %c0_13] : memref<8x128xf32, #tpu.memory_space<vmem>>, vector<8x128xf32>
      tpu.vector_store %arg5[%c0_12, %c0_13], %21 {strides = array<i32>} : memref<8x128xf32, #tpu.memory_space<vmem>>, vector<8x128xf32>,
    } else {
    }
    %c0_i32_3 = arith.constant 0 : i32
    %8 = arith.cmpi sge, %1, %c0_i32_3 : i32
    %9 = arith.extui %8 : i1 to i32
    %c0_i32_4 = arith.constant 0 : i32
    %10 = arith.cmpi ne, %9, %c0_i32_4 : i32
    scf.if %10 {
      %c0 = arith.constant 0 : index
      %c0_7 = arith.constant 0 : index
      %14 = vector.load %arg2[%c0, %c0_7] : memref<16x128xf32, #tpu.memory_space<vmem>>, vector<16x128xf32>
      %c0_8 = arith.constant 0 : index
      %c0_9 = arith.constant 0 : index
      %15 = vector.load %arg3[%c0_8, %c0_9] : memref<16x128xf32, #tpu.memory_space<vmem>>, vector<16x128xf32>
      %16 = arith.subf %14, %15 : vector<16x128xf32>
      %17 = arith.mulf %16, %16 : vector<16x128xf32>
      %c16_i32 = arith.constant 16 : i32
      %18 = arith.muli %1, %c16_i32 : i32
      %c16_i32_10 = arith.constant 16 : i32
      %19 = arith.subi %c16_i32_10, %18 : i32
      %20 = tpu.iota {dimensions = array<i32: 0>} : vector<16x128xi32>
      %21 = vector.broadcast %19 : i32 to vector<16x128xi32>
      %22 = arith.cmpi slt, %20, %21 : vector<16x128xi32>
      %cst = arith.constant 0.000000e+00 : f32
      %23 = vector.broadcast %cst : f32 to vector<16x128xf32>
      %24 = arith.select %22, %17, %23 : vector<16x128xi1>, vector<16x128xf32>
      %c0_11 = arith.constant 0 : index
      %c0_12 = arith.constant 0 : index
      %25 = vector.load %arg5[%c0_11, %c0_12] : memref<8x128xf32, #tpu.memory_space<vmem>>, vector<8x128xf32>
      %26 = vector.shape_cast %24 : vector<16x128xf32> to vector<2x8x128xf32>
      %cst_13 = arith.constant dense<0.000000e+00> : vector<8x128xf32>
      %27 = vector.multi_reduction <add>, %26, %cst_13 [0] : vector<2x8x128xf32> to vector<8x128xf32>
      %28 = arith.addf %25, %27 : vector<8x128xf32>
      %c0_14 = arith.constant 0 : index
      %c0_15 = arith.constant 0 : index
      %29 = vector.load %arg5[%c0_14, %c0_15] : memref<8x128xf32, #tpu.memory_space<vmem>>, vector<8x128xf32>
      tpu.vector_store %arg5[%c0_14, %c0_15], %28 {strides = array<i32>} : memref<8x128xf32, #tpu.memory_space<vmem>>, vector<8x128xf32>,
    } else {
    }
    %c0_i32_5 = arith.constant 0 : i32
    %11 = arith.cmpi eq, %arg1, %c0_i32_5 : i32
    %12 = arith.extui %11 : i1 to i32
    %c0_i32_6 = arith.constant 0 : i32
    %13 = arith.cmpi ne, %12, %c0_i32_6 : i32
    scf.if %13 {
      %c0 = arith.constant 0 : index
      %c0_7 = arith.constant 0 : index
      %14 = vector.load %arg5[%c0, %c0_7] : memref<8x128xf32, #tpu.memory_space<vmem>>, vector<8x128xf32>
      %c0_8 = arith.constant 0 : index
      %c0_9 = arith.constant 0 : index
      %15 = vector.load %arg4[%c0_8, %c0_9] : memref<8x128xf32, #tpu.memory_space<vmem>>, vector<8x128xf32>
      tpu.vector_store %arg4[%c0_8, %c0_9], %14 {strides = array<i32>} : memref<8x128xf32, #tpu.memory_space<vmem>>, vector<8x128xf32>,
    } else {
    }
    return
  }
  func.func @transform_0(%arg0: i32, %arg1: i32) -> (i32, i32) {
    %c1_i32 = arith.constant 1 : i32
    %0 = arith.muli %arg0, %c1_i32 : i32
    %1 = arith.addi %0, %arg1 : i32
    %c0_i32 = arith.constant 0 : i32
    %2 = arith.minsi %1, %c0_i32 : i32
    %c0_i32_0 = arith.constant 0 : i32
    %c0_i32_1 = arith.constant 0 : i32
    return %2, %c0_i32_0 : i32, i32
  }
  func.func @transform_1(%arg0: i32, %arg1: i32) -> (i32, i32) {
    %c1_i32 = arith.constant 1 : i32
    %0 = arith.muli %arg0, %c1_i32 : i32
    %1 = arith.addi %0, %arg1 : i32
    %c0_i32 = arith.constant 0 : i32
    %2 = arith.minsi %1, %c0_i32 : i32
    %c0_i32_0 = arith.constant 0 : i32
    %c0_i32_1 = arith.constant 0 : i32
    return %2, %c0_i32_0 : i32, i32
  }
  func.func @transform_2(%arg0: i32, %arg1: i32) -> (i32, i32) {
    %c0_i32 = arith.constant 0 : i32
    %c0_i32_0 = arith.constant 0 : i32
    return %arg0, %c0_i32 : i32, i32
  }
}

</mosaic_0001>

<bundles_post_ra>
// kernel: tpu_custom_call.1
= control target key start
LH: loop header
LB: loop body
LE: loop exit
PB: predicated region body
PF: predicated region fallthrough
CT: control target
= control target key end

     0   :  { %7 = vsyncpa [#allocation4], 0  ;;  %s233_s0 = inlined_call_operand.hbm [shape: f32[16,128], index: 0, kind: input, shape index: {}]   ;;  %s234_s1 = inlined_call_operand.hbm [shape: f32[16,128], index: 1, kind: input, shape index: {}]   ;;  %s235_s2 = inlined_call_operand.hbm [shape: f32[8,128], index: 2, kind: output, shape index: {}]  }
   0x1   :  { %8 = vsyncpa [#allocation7], 0 }
   0x2   :  { %9 = vsyncpa [#allocation5], 0  ;;  %s204_s9 = smov [#allocation3]  }
   0x3   :  { %s21_s10 = sshll.u32 %s204_s9, 4  ;;  %s22_s10 = int_to_ptr.vmem [resolvable:$true] %s21_s10 }
   0x4   :  { %s146_s11 = scalar_lea.vmem %s22_s10, 256  ;;  %p151_p1 = scmp.lt.s32.totalorder %s22_s10, %s22_s10 }
   0x5   :  { %p147_p0 = scmp.ne.s32.totalorder %s22_s10, %s146_s11  ;;  %p152_p2 = scmp.lt.s32.totalorder %s146_s11, %s146_s11 }
   0x7   :  { %p153_p3 = por %p152_p2, %p151_p1 }
   0x9   :  { %p154_p4 = pnand %p153_p3, %p147_p0 }
   0xb   :  { %157 = shalt.err (!%p154_p4)
}
   0xc   :  { %s205_s12 = smov 128   ;;  %s206_s13 = smov 8  }
   0xd   :  { %27 = dma.hbm_to_vmem [thread:$0]  %s233_s0, 256, %s22_s10, [#allocation4], %s205_s12, %s205_s12, %s206_s13  }
   0xe   :  { %s207_s16 = smov [#allocation6]  }
   0xf   :  { %s39_s17 = sshll.u32 %s207_s16, 4  ;;  %s40_s17 = int_to_ptr.vmem [resolvable:$true] %s39_s17 }
  0x10   :  { %s166_s18 = scalar_lea.vmem %s40_s17, 256  ;;  %p171_p6 = scmp.lt.s32.totalorder %s40_s17, %s40_s17 }
  0x11   :  { %p167_p5 = scmp.ne.s32.totalorder %s40_s17, %s166_s18  ;;  %p172_p7 = scmp.lt.s32.totalorder %s166_s18, %s166_s18 }
  0x13   :  { %p173_p8 = por %p172_p7, %p171_p6 }
  0x15   :  { %p174_p9 = pnand %p173_p8, %p167_p5 }
  0x17   :  { %177 = shalt.err (!%p174_p9)
}
  0x18   :  { %45 = dma.hbm_to_vmem [thread:$0]  %s234_s1, 256, %s40_s17, [#allocation7], %s205_s12, %s205_s12, %s206_s13  }
  0x19   :  { %198 = dma.done.wait [#allocation4], 256  }
  0x1a   :  { %199 = vsyncadd [#allocation4], 4294967040 }
  0x1b   :  { %200 = dma.done.wait [#allocation7], 256  }
  0x1c   :  { %201 = vsyncadd [#allocation7], 4294967040  ;;  %v86_v0 = vld [vmem:[#allocation3] sm:$0xff]  ;;  %v87_v1 = vld [vmem:[#allocation3 + $0x8] sm:$0xff]  ;;  %s208_s0 = smov [#allocation8]  }
  0x1d   :  { %v88_v2 = vld [vmem:[#allocation6] sm:$0xff]  ;;  %v89_v3 = vld [vmem:[#allocation6 + $0x8] sm:$0xff]  ;;  %s119_s21 = sshll.u32 %s208_s0, 4  ;;  %s120_s21 = int_to_ptr.vmem [resolvable:$true] %s119_s21 }
  0x1e   :  { %v90_v4 = vsub.f32 %v86_v0, %v88_v2  ;;  %v91_v5 = vsub.f32 %v87_v1, %v89_v3  ;;  %s178_s22 = scalar_lea.vmem %s120_s21, 128  ;;  %p183_p11 = scmp.lt.s32.totalorder %s120_s21, %s120_s21 }
  0x1f   :  { %p179_p10 = scmp.ne.s32.totalorder %s120_s21, %s178_s22  ;;  %p184_p12 = scmp.lt.s32.totalorder %s178_s22, %s178_s22 }
  0x20   :  { %v92_v6 = vmul.f32 %v90_v4, %v90_v4  ;;  %v93_v7 = vmul.f32 %v91_v5, %v91_v5 }
  0x21   :  { %p185_p13 = por %p184_p12, %p183_p11 }
  0x22   :  { %v105_v8 = vadd.f32 %v93_v7, %v92_v6 }
  0x23   :  { %p186_p0 = pnand %p185_p13, %p179_p10 }
  0x24   :  { %112 = vst [vmem:[#allocation8] sm:$0xff] %v105_v8 }
  0x25   :  { %189 = shalt.err (!%p186_p0)
}
  0x26   :  { %122 = dma.vmem_to_hbm [thread:$0]  %s120_s21, 128, %s235_s2, [#allocation5]  }
  0x27   :  { %202 = dma.done.wait [#allocation5], 128  }
  0x28   :  { %203 = vsyncadd [#allocation5], 4294967168 }
  0x29   :  { %126 = vsyncpa [#allocation4], 1 }
  0x2a   :  { %127 = vsyncpa [#allocation7], 1 }
  0x2b   :  { %128 = vsyncpa [#allocation5], 1 }

</bundles_post_ra>
